<compile_context>
chip_gen: v5e
topology: v5e:2x2
jax: 0.10.0
libtpu: 0.0.40
codegen_flags: <defaults>
</compile_context>

<pallas_src>
import jax
import jax.numpy as jnp
from jax.experimental import pallas as pl
from jax.experimental.pallas import tpu as pltpu


def _value_mlp_kernel(x_ref, w1_ref, b1_ref, w2_ref, b2_ref, w3_ref, b3_ref, o_ref):
    # layer 1: (TB, ob) @ (ob, L) on the MXU (bf16 inputs, f32 accumulation).
    h1 = jnp.dot(x_ref[...], w1_ref[...], preferred_element_type=jnp.float32)
    h1 = jnp.maximum(h1 + b1_ref[...], 0.0)                       # f32
    # layer 2: cast activations back to bf16 for the MXU, accumulate in f32.
    h2 = jnp.dot(h1.astype(w2_ref.dtype), w2_ref[...],
                 preferred_element_type=jnp.float32)
    h2 = jnp.maximum(h2 + b2_ref[...], 0.0)                       # (TB, L) f32
    # layer 3 (out_features == 1): VPU multiply + lane reduction instead of an
    # N=1 MXU matmul; write lane-dense as a (1, TB) row.
    v = jnp.sum(h2 * w3_ref[...], axis=-1)                        # (TB,)
    o_ref[...] = (v[None, :] + b3_ref[...]).astype(o_ref.dtype)   # (1, TB)


def _round_up(n, m):
    return ((n + m - 1) // m) * m


def value_network_forward(x, params, *, tb_max=1024):
    """ValueNetwork forward.  x: (B, ob_size) f32 -> (B,) (scalar if B == 1)."""
    w1, b1, w2, b2, w3, b3 = params
    B, ob = x.shape
    L = w1.shape[1]

    # Batch tile: small batches run as one grid step; large batches use a
    # lane-dense row tile (multiple of 8 and 128) and pad B up to it.
    B_pad = _round_up(B, 8)
    if B_pad <= tb_max:
        TB = B_pad
    else:
        TB = tb_max                       # 1024: multiple of 8 and of 128
        B_pad = _round_up(B, TB)

    if B_pad != B:
        x = jnp.pad(x, ((0, B_pad - B), (0, 0)))

    # bf16 MXU inputs (halves HBM traffic on the memory-bound x reads).
    x_bf = x.astype(jnp.bfloat16)
    w1_bf = w1.astype(jnp.bfloat16)
    w2_bf = w2.astype(jnp.bfloat16)

    grid = (B_pad // TB,)

    def resident(shape):
        # Constant block index -> parameter stays resident in VMEM across steps.
        return pl.BlockSpec(shape, lambda i: (0, 0))

    flops = 2 * B_pad * (ob * L + L * L + L)
    bytes_accessed = (x_bf.size * 2 + w1_bf.size * 2 + w2_bf.size * 2
                      + (b1.size + b2.size + w3.size + b3.size) * 4
                      + B_pad * 4)

    out = pl.pallas_call(
        _value_mlp_kernel,
        out_shape=jax.ShapeDtypeStruct((1, B_pad), jnp.float32),
        grid=grid,
        in_specs=[
            pl.BlockSpec((TB, ob), lambda i: (i, 0)),     # x: tiled over batch
            resident(w1_bf.shape), resident(b1.shape),
            resident(w2_bf.shape), resident(b2.shape),
            resident(w3.shape), resident(b3.shape),
        ],
        out_specs=pl.BlockSpec((1, TB), lambda i: (0, i)),  # lane-dense output
        compiler_params=pltpu.CompilerParams(
            dimension_semantics=("parallel",)),
        cost_estimate=pl.CostEstimate(
            flops=flops, transcendentals=0, bytes_accessed=bytes_accessed),
    )(x_bf, w1_bf, b1, w2_bf, b2, w3, b3)

    vals = out[0, :B]
    # PyTorch .squeeze(): (B,) for B > 1, 0-d scalar for B == 1.
    return jnp.squeeze(vals) if B == 1 else vals


def init_params(key, ob_size, layer_size):
    """nn.Linear-style init (uniform +/- 1/sqrt(fan_in)).

    w1/w2 stored as (in, out); w3 stored as (1, layer_size) so the kernel's
    x @ W + b and sum(h * w3) reproduce PyTorch's x @ W.T + b exactly.
    """
    ks = jax.random.split(key, 6)

    def lin(kw, kb, fan_in, shape_w, shape_b):
        bound = 1.0 / (fan_in ** 0.5)
        w = jax.random.uniform(kw, shape_w, jnp.float32, -bound, bound)
        b = jax.random.uniform(kb, shape_b, jnp.float32, -bound, bound)
        return w, b

    w1, b1 = lin(ks[0], ks[1], ob_size, (ob_size, layer_size), (1, layer_size))
    w2, b2 = lin(ks[2], ks[3], layer_size, (layer_size, layer_size), (1, layer_size))
    w3, b3 = lin(ks[4], ks[5], layer_size, (1, layer_size), (1, 1))
    return (w1, b1, w2, b2, w3, b3)


def reference_forward(x, params):
    """Plain-JAX reference using the same bf16-input / f32-accumulate recipe."""
    w1, b1, w2, b2, w3, b3 = params
    xb = x.astype(jnp.bfloat16)
    h1 = jnp.maximum(jnp.dot(xb, w1.astype(jnp.bfloat16),
                             preferred_element_type=jnp.float32) + b1, 0.0)
    h2 = jnp.maximum(jnp.dot(h1.astype(jnp.bfloat16), w2.astype(jnp.bfloat16),
                             preferred_element_type=jnp.float32) + b2, 0.0)
    v = jnp.sum(h2 * w3, axis=-1) + b3[0, 0]
    return jnp.squeeze(v) if x.shape[0] == 1 else v


# TODO(synk): calc_advantage / discount_cumsum (scipy.signal.lfilter on host numpy)
# is post-processing outside the forward pass and is not implemented as a kernel.

if __name__ == "__main__":
    key = jax.random.PRNGKey(0)
    k_params, k_x = jax.random.split(key)

    ob_size = 16
    layer_size = 32
    batch = 8

    params = init_params(k_params, ob_size, layer_size)
    x = jax.random.normal(k_x, (batch, ob_size), jnp.float32)

    out = jax.block_until_ready(value_network_forward(x, params))
    ref = reference_forward(x, params)

    assert out.shape == (batch,), out.shape
    assert jnp.allclose(out, ref, atol=1e-3, rtol=1e-3), (out, ref)

    print("KERNEL_OK")
</pallas_src>

<mosaic_0001>
module attributes {stable_mosaic.version = 11 : i64} {
  func.func @_value_mlp_kernel(%arg0: i32, %arg1: memref<8x16xbf16, #tpu.memory_space<vmem>>, %arg2: memref<16x32xbf16, #tpu.memory_space<vmem>>, %arg3: memref<1x32xf32, #tpu.memory_space<vmem>>, %arg4: memref<32x32xbf16, #tpu.memory_space<vmem>>, %arg5: memref<1x32xf32, #tpu.memory_space<vmem>>, %arg6: memref<1x32xf32, #tpu.memory_space<vmem>>, %arg7: memref<1x1xf32, #tpu.memory_space<vmem>>, %arg8: memref<1x8xf32, #tpu.memory_space<vmem>>) attributes {dimension_semantics = [#tpu.dimension_semantics<parallel>], iteration_bounds = array<i64: 1>, scalar_prefetch = 0 : i64, scratch_operands = 0 : i64, tpu.core_type = #tpu.core_type<tc>, window_params = [{transform_indices = @transform_0, window_bounds = array<i64: 8, 16>}, {pipeline_mode = #tpu.pipeline_mode<synchronous>, transform_indices = @transform_1, window_bounds = array<i64: 16, 32>}, {pipeline_mode = #tpu.pipeline_mode<synchronous>, transform_indices = @transform_2, window_bounds = array<i64: 1, 32>}, {pipeline_mode = #tpu.pipeline_mode<synchronous>, transform_indices = @transform_3, window_bounds = array<i64: 32, 32>}, {pipeline_mode = #tpu.pipeline_mode<synchronous>, transform_indices = @transform_4, window_bounds = array<i64: 1, 32>}, {pipeline_mode = #tpu.pipeline_mode<synchronous>, transform_indices = @transform_5, window_bounds = array<i64: 1, 32>}, {pipeline_mode = #tpu.pipeline_mode<synchronous>, transform_indices = @transform_6, window_bounds = array<i64: 1, 1>}, {transform_indices = @transform_7, window_bounds = array<i64: 1, 8>}]} {
    %c0 = arith.constant 0 : index
    %c0_0 = arith.constant 0 : index
    %0 = vector.load %arg1[%c0, %c0_0] : memref<8x16xbf16, #tpu.memory_space<vmem>>, vector<8x16xbf16>
    %c0_1 = arith.constant 0 : index
    %c0_2 = arith.constant 0 : index
    %1 = vector.load %arg2[%c0_1, %c0_2] : memref<16x32xbf16, #tpu.memory_space<vmem>>, vector<16x32xbf16>
    %cst = arith.constant dense<0.000000e+00> : vector<8x32xf32>
    %2 = tpu.matmul %0, %1, %cst {dimension_numbers = #tpu.dot_dimension_numbers<[1], [0], [0], [1], [0, 0, 1, 1], [], []>} : vector<8x16xbf16>, vector<16x32xbf16>, vector<8x32xf32> -> vector<8x32xf32>
    %c0_3 = arith.constant 0 : index
    %c0_4 = arith.constant 0 : index
    %3 = vector.load %arg3[%c0_3, %c0_4] : memref<1x32xf32, #tpu.memory_space<vmem>>, vector<1x32xf32>
    %4 = vector.broadcast %3 : vector<1x32xf32> to vector<8x32xf32>
    %5 = arith.addf %2, %4 : vector<8x32xf32>
    %cst_5 = arith.constant 0.000000e+00 : f32
    %6 = vector.broadcast %cst_5 : f32 to vector<8x32xf32>
    %7 = arith.maximumf %5, %6 : vector<8x32xf32>
    %8 = arith.truncf %7 : vector<8x32xf32> to vector<8x32xbf16>
    %c0_6 = arith.constant 0 : index
    %c0_7 = arith.constant 0 : index
    %9 = vector.load %arg4[%c0_6, %c0_7] : memref<32x32xbf16, #tpu.memory_space<vmem>>, vector<32x32xbf16>
    %cst_8 = arith.constant dense<0.000000e+00> : vector<8x32xf32>
    %10 = tpu.matmul %8, %9, %cst_8 {dimension_numbers = #tpu.dot_dimension_numbers<[1], [0], [0], [1], [0, 0, 1, 1], [], []>} : vector<8x32xbf16>, vector<32x32xbf16>, vector<8x32xf32> -> vector<8x32xf32>
    %c0_9 = arith.constant 0 : index
    %c0_10 = arith.constant 0 : index
    %11 = vector.load %arg5[%c0_9, %c0_10] : memref<1x32xf32, #tpu.memory_space<vmem>>, vector<1x32xf32>
    %12 = vector.broadcast %11 : vector<1x32xf32> to vector<8x32xf32>
    %13 = arith.addf %10, %12 : vector<8x32xf32>
    %cst_11 = arith.constant 0.000000e+00 : f32
    %14 = vector.broadcast %cst_11 : f32 to vector<8x32xf32>
    %15 = arith.maximumf %13, %14 : vector<8x32xf32>
    %c0_12 = arith.constant 0 : index
    %c0_13 = arith.constant 0 : index
    %16 = vector.load %arg6[%c0_12, %c0_13] : memref<1x32xf32, #tpu.memory_space<vmem>>, vector<1x32xf32>
    %17 = vector.broadcast %16 : vector<1x32xf32> to vector<8x32xf32>
    %18 = arith.mulf %15, %17 : vector<8x32xf32>
    %cst_14 = arith.constant dense<0.000000e+00> : vector<8xf32>
    %19 = vector.multi_reduction <add>, %18, %cst_14 [1] : vector<8x32xf32> to vector<8xf32>
    %20 = vector.shape_cast %19 : vector<8xf32> to vector<1x8xf32>
    %c0_15 = arith.constant 0 : index
    %c0_16 = arith.constant 0 : index
    %21 = vector.load %arg7[%c0_15, %c0_16] : memref<1x1xf32, #tpu.memory_space<vmem>>, vector<1x1xf32>
    %22 = vector.broadcast %21 : vector<1x1xf32> to vector<1x8xf32>
    %23 = arith.addf %20, %22 : vector<1x8xf32>
    %c0_17 = arith.constant 0 : index
    %c0_18 = arith.constant 0 : index
    %24 = vector.load %arg8[%c0_17, %c0_18] : memref<1x8xf32, #tpu.memory_space<vmem>>, vector<1x8xf32>
    tpu.vector_store %arg8[%c0_17, %c0_18], %23 {strides = array<i32>} : memref<1x8xf32, #tpu.memory_space<vmem>>, vector<1x8xf32>,
    return
  }
  func.func @transform_0(%arg0: i32) -> (i32, i32) {
    %c0_i32 = arith.constant 0 : i32
    %c0_i32_0 = arith.constant 0 : i32
    return %arg0, %c0_i32 : i32, i32
  }
  func.func @transform_1(%arg0: i32) -> (i32, i32) {
    %c0_i32 = arith.constant 0 : i32
    %c0_i32_0 = arith.constant 0 : i32
    %c0_i32_1 = arith.constant 0 : i32
    return %c0_i32, %c0_i32_0 : i32, i32
  }
  func.func @transform_2(%arg0: i32) -> (i32, i32) {
    %c0_i32 = arith.constant 0 : i32
    %c0_i32_0 = arith.constant 0 : i32
    %c0_i32_1 = arith.constant 0 : i32
    return %c0_i32, %c0_i32_0 : i32, i32
  }
  func.func @transform_3(%arg0: i32) -> (i32, i32) {
    %c0_i32 = arith.constant 0 : i32
    %c0_i32_0 = arith.constant 0 : i32
    %c0_i32_1 = arith.constant 0 : i32
    return %c0_i32, %c0_i32_0 : i32, i32
  }
  func.func @transform_4(%arg0: i32) -> (i32, i32) {
    %c0_i32 = arith.constant 0 : i32
    %c0_i32_0 = arith.constant 0 : i32
    %c0_i32_1 = arith.constant 0 : i32
    return %c0_i32, %c0_i32_0 : i32, i32
  }
  func.func @transform_5(%arg0: i32) -> (i32, i32) {
    %c0_i32 = arith.constant 0 : i32
    %c0_i32_0 = arith.constant 0 : i32
    %c0_i32_1 = arith.constant 0 : i32
    return %c0_i32, %c0_i32_0 : i32, i32
  }
  func.func @transform_6(%arg0: i32) -> (i32, i32) {
    %c0_i32 = arith.constant 0 : i32
    %c0_i32_0 = arith.constant 0 : i32
    %c0_i32_1 = arith.constant 0 : i32
    return %c0_i32, %c0_i32_0 : i32, i32
  }
  func.func @transform_7(%arg0: i32) -> (i32, i32) {
    %c0_i32 = arith.constant 0 : i32
    %c0_i32_0 = arith.constant 0 : i32
    return %c0_i32, %arg0 : i32, i32
  }
}

</mosaic_0001>

<bundles_post_ra>
// kernel: tpu_custom_call.1
= control target key start
LH: loop header
LB: loop body
LE: loop exit
PB: predicated region body
PF: predicated region fallthrough
CT: control target
= control target key end

     0   :  { %s387_s0 = inlined_call_operand.hbm [shape: bf16[8,16], index: 0, kind: input, shape index: {}]   ;;  %s388_s1 = inlined_call_operand.hbm [shape: bf16[16,32], index: 1, kind: input, shape index: {}]   ;;  %s389_s2 = inlined_call_operand.vmem [shape: f32[1,32], index: 2, kind: input, shape index: {}]   ;;  %s390_s3 = inlined_call_operand.hbm [shape: bf16[32,32], index: 3, kind: input, shape index: {}]   ;;  %s391_s4 = inlined_call_operand.vmem [shape: f32[1,32], index: 4, kind: input, shape index: {}]   ;;  %s392_s5 = inlined_call_operand.vmem [shape: f32[1,32], index: 5, kind: input, shape index: {}]   ;;  %s393_s6 = inlined_call_operand.<no memory space> [shape: f32[1,1], index: 6, kind: input, shape index: {}]   ;;  %s394_s7 = inlined_call_operand.hbm [shape: f32[1,8], index: 7, kind: output, shape index: {}]  }
   0x1   :  { %v12_v0 = vstv %s393_s6 }
   0x2   :  { %13 = vst [vmem:[#allocation2] sm:$0x1] %v12_v0 }
   0x3   :  { %14 = vsyncpa [#allocation4], 0 }
   0x4   :  { %15 = vsyncpa [#allocation7], 0  ;;  %s32_s28 = sshll.u32 %s388_s1, 4  ;;  %s33_s28 = int_to_ptr.hbm [resolvable:$true] %s32_s28 }
   0x5   :  { %16 = vsyncpa [#allocation5], 0  ;;  %s316_s29 = smov [#allocation6]   ;;  %s22_s10 = sshll.u32 %s387_s0, 4  ;;  %s23_s10 = int_to_ptr.hbm [resolvable:$true] %s22_s10 }
   0x6   :  { %s34_s30 = sshll.u32 %s316_s29, 4  ;;  %s317_s11 = smov 64   ;;  %s35_s30 = int_to_ptr.vmem [resolvable:$true] %s34_s30 }
   0x7   :  { %s318_s12 = smov 4   ;;  %s319_s6 = smov [#allocation3]  }
   0x8   :  { %40 = dma.hbm_to_vmem [thread:$0]  %s33_s28, 128, %s35_s30, [#allocation7], %s317_s11, %s317_s11, %s318_s12  }
   0x9   :  { %s24_s13 = sshll.u32 %s319_s6, 4  ;;  %s47_s16 = sshll.u32 %s390_s3, 4  ;;  %s25_s13 = int_to_ptr.vmem [resolvable:$true] %s24_s13  ;;  %s48_s16 = int_to_ptr.hbm [resolvable:$true] %s47_s16 }
   0xa   :  { %27 = dma.hbm_to_vmem [thread:$0]  %s23_s10, 64, %s25_s13, [#allocation4]  }
   0xb   :  { %s320_s1 = smov [#allocation8]  }
   0xc   :  { %s49_s17 = sshll.u32 %s320_s1, 4  ;;  %s50_s17 = int_to_ptr.vmem [resolvable:$true] %s49_s17 }
   0xd   :  { %55 = dma.hbm_to_vmem [thread:$0]  %s48_s16, 256, %s50_s17, [#allocation7], %s317_s11, %s317_s11, %s318_s12  }
   0xe   :  { %310 = dma.done.wait [#allocation4], 64  }
   0xf   :  { %311 = vsyncadd [#allocation4], 4294967232 }
  0x10   :  { %312 = dma.done.wait [#allocation7], 384  }
  0x11   :  { %313 = vsyncadd [#allocation7], 4294966912  ;;  %v200_v1 = vld [vmem:[#allocation6] sm:$0xff]  ;;  %v75_v2 = vld [vmem:[#allocation3] sm:$0xf]  ;;  %vm88_vm0 = vcmask 130048   ;;  %v162_v22 = vlaneseq }
  0x12   :  { %99 = vmatpush.bf16.msra.mxu0 %v200_v1  ;;  %v202_v3 = vld [vmem:[#allocation8 + $0x8] sm:$0xff]  ;;  %v201_v4 = vld [vmem:[#allocation8] sm:$0xff]  ;;  %v153_v5 = vld [vmem:[#allocation2] sm:$0x1]  ;;  %v321_v6 = vmov 0   ;;  %vm127_vm1 = vcmask 261120  }
  0x13   :  { %137 = vmatpush.bf16.msra.mxu1 %v202_v3  ;;  %210 = vset.pattern.permute.xlu0 %v321_v6  ;;  %v211_v7 = vld [vmem:[%s389_s2] ss:$0 sm:$0xff]  ;;  %v163_v24 = vand.u32 127, %v162_v22  ;;  %s322_s2 = smov [#allocation9]   ;;  %s175_s24 = sshll.u32 %s394_s7, 4  ;;  %vm166_vm2 = vcmask 57344   ;;  %s176_s24 = int_to_ptr.hbm [resolvable:$true] %s175_s24 }
  0x14   :  { %156 = vperm.xlu0 %210, %v153_v5   ;;  %v212_v13 = vld [vmem:[%s391_s4] ss:$0 sm:$0xff]  ;;  %s173_s22 = sshll.u32 %s322_s2, 4  ;;  %s174_s22 = int_to_ptr.vmem [resolvable:$true] %s173_s22 }
  0x15   :  { %190 = vmatmul.msk.bf16.vlgmr.msra.gmra.mxu0 %vm88_vm0, %v75_v2  ;;  %v213_v16 = vld [vmem:[%s392_s5] ss:$0 sm:$0xff] }
  0x17   :  { %138 = vmatpush.bf16.msra.mxu1 %v201_v4 }
  0x86   :  { %v157_v21 = vpop.permute.xlu0 %156 }
  0x87   :  { %v159_v23 = vperm.slane %v157_v21, 0 }
  0x92   :  { %v101_v8 = vpop.f32.mrf.mxu0 }
  0x93   :  { %v102_v9 = vadd.f32 %v211_v7, %v101_v8 }
  0x95   :  { %v105_v10 = vmax.f32 %v102_v9, 0.0 }
  0x97   :  { %v106_v11 = vpack.c.bf16 %v105_v10, %v105_v10 }
  0x99   :  { %199 = vmatmul.msk.bf16.vlgmr.msra.gmra.mxu1 %vm127_vm1, %v106_v11 }
  0x9a   :  { %v103_v12 = vpop.f32.mrf.mxu0 }
 0x116   :  { %v140_v14 = vpop.f32.mrf.mxu1 }
 0x117   :  { %v141_v15 = vadd.f32 %v212_v13, %v140_v14 }
 0x119   :  { %v144_v17 = vmax.f32 %v141_v15, 0.0 }
 0x11b   :  { %v149_v18 = vmul.f32 %v213_v16, %v144_v17 }
 0x11d   :  { %v150_v19 = vsel %vm127_vm1, %v149_v18, 0.0 }
 0x11e   :  { %v142_v20 = vpop.f32.mrf.mxu1  ;;  %151 = vadd.xlane.f32.xlu0 %v150_v19 }
 0x191   :  { %v152_v25 = vpop.xlane.xlu0 %151 }
 0x192   :  { %v160_v26 = vadd.f32 %v159_v23, %v152_v25 }
 0x194   :  { %v164_v27 = vperm.slane %v160_v26, %v163_v24 }
 0x196   :  { %167 = vst.msk [vmem:[#allocation9] sm:$0x1] %vm166_vm2, %v164_v27 }
 0x197   :  { %178 = dma.vmem_to_hbm [thread:$0]  %s174_s22, 16, %s176_s24, [#allocation5]  }
 0x198   :  { %314 = dma.done.wait [#allocation5], 16  }
 0x199   :  { %315 = vsyncadd [#allocation5], 4294967280 }
 0x19a   :  { %183 = vsyncpa [#allocation4], 1 }
 0x19b   :  { %184 = vsyncpa [#allocation7], 1 }
 0x19c   :  { %185 = vsyncpa [#allocation5], 1 }

</bundles_post_ra>
